<compile_context>
chip_gen: v7x
topology: tpu7x:2x2x1
jax: 0.10.0
libtpu: 0.0.40
codegen_flags: <defaults>
</compile_context>

<pallas_src>
import functools

import jax
import jax.numpy as jnp
from jax.experimental import pallas as pl
from jax.experimental.pallas import tpu as pltpu

_TARGET_BLOCK = 4 << 20      # ~1-4 MiB streaming blocks reach ~85%+ of the HBM roofline


def _round_down(n, m):
    return (n // m) * m


@functools.lru_cache(maxsize=None)
def _default_vmem_budget():
    """Generation-aware working-set cap: ~88 MiB on 128 MiB v5e/v6e, ~40 MiB on 64 MiB v7x."""
    try:
        cap = int(pltpu.get_tpu_info().vmem_capacity_bytes)
    except Exception:
        cap = 64 << 20           # conservative default (v7x per-core VMEM)
    return max(32 << 20, cap * 3 // 4 - (8 << 20))


def _pick_batch_tile(batch, slab_bytes, target_bytes):
    """Largest divisor of `batch` whose block stays under `target_bytes`, keeping enough grid
    steps that a v7x megacore (2 TCs sharding the 'parallel' axis) has >=2 steps per core."""
    if batch >= 4:
        max_d = batch // 4
    elif batch >= 2:
        max_d = batch // 2
    else:
        max_d = 1
    best = 1
    for d in range(1, max_d + 1):
        if batch % d == 0 and d * slab_bytes <= target_bytes:
            best = d
    return best


def _excite(pooled_f32, w1t, w2t):
    """(., C) f32 pooled means -> sigmoid(relu(y @ W1^T) @ W2^T) with f32 accumulation.
    Weights stay in their native dtype (no per-step upcast)."""
    lhs = pooled_f32 if w1t.dtype == jnp.float32 else pooled_f32.astype(w1t.dtype)
    h = jnp.maximum(jnp.dot(lhs, w1t, preferred_element_type=jnp.float32), 0.0)
    lhs2 = h if w2t.dtype == jnp.float32 else h.astype(w2t.dtype)
    s = jnp.dot(lhs2, w2t, preferred_element_type=jnp.float32)
    return jax.nn.sigmoid(s)


# ---------------------------------------------------------------------------
# Fused one-pass kernel (whole (Bt, C, HW) slab resident in VMEM).
# ---------------------------------------------------------------------------
def _se_fused_kernel(x_ref, w1t_ref, w2t_ref, o_ref, *, inv_hw):
    # x_ref/o_ref: (Bt, C, HW);  w1t_ref: (C, C_red);  w2t_ref: (C_red, C).
    xb = x_ref[...]                                               # native dtype, read once
    # Squeeze: f32-accumulated mean over the spatial (lane) axis — no f32 copy of the tile.
    pooled = jnp.sum(xb, axis=2, dtype=jnp.float32) * inv_hw      # (Bt, C)
    # Excitation: with Bt batching these are real (Bt,C)@(C,Cr) matmuls, not N=1 matvecs.
    s = _excite(pooled, w1t_ref[...], w2t_ref[...]).astype(xb.dtype)
    # Scale in the input's native dtype: 1 vld + 1 vmul + 1 vst per element.
    o_ref[...] = xb * s[:, :, None]


# ---------------------------------------------------------------------------
# Two-phase fallback kernels (channels-first, C/HW tiled, in-kernel tail masking).
# ---------------------------------------------------------------------------
def _se_pool_kernel(x_ref, o_ref, *, hw, t_hw, mask_tail):
    # x_ref: (1, Tc, Thw);  o_ref: (1, Tc, 1) f32, accumulated over the HW grid axis.
    @pl.when(pl.program_id(2) == 0)
    def _():
        o_ref[...] = jnp.zeros_like(o_ref)

    xb = x_ref[...]
    if mask_tail:
        # Mask garbage lanes of the partial trailing HW tile so they never enter the sum.
        col = jax.lax.broadcasted_iota(jnp.int32, xb.shape, 2)
        valid = (pl.program_id(2) * t_hw + col) < hw
        xb = jnp.where(valid, xb, jnp.zeros((), xb.dtype))
    o_ref[...] += jnp.sum(xb, axis=2, keepdims=True, dtype=jnp.float32)


def _se_scale_kernel(x_ref, s_ref, o_ref):
    # x_ref/o_ref: (1, Tc, Thw);  s_ref: (1, Tc, 1) f32 per-channel gate.
    # Out-of-range lanes/rows of a partial tile are write-masked by Pallas; no pad needed.
    xb = x_ref[...]
    o_ref[...] = xb * s_ref[...].astype(xb.dtype)


def _se_two_phase_cf(x2, w1t, w2t, *, target_block_bytes, vmem_limit_bytes, in_place):
    """Channels-first x2 = (B, C, HW): tiled pool (HW as 'arbitrary' reduction axis with an
    accumulated output block and in-kernel tail masking), tiny XLA excitation, tiled
    broadcast-multiply.  3 HBM passes; never keeps a full (C, HW) slab resident in VMEM."""
    B, C, HW = x2.shape
    itemsize = jnp.dtype(x2.dtype).itemsize

    # Lane (HW) tile: full extent when it fits, else a multiple of 128 with a masked tail.
    t_hw_cap = max(128, _round_down(target_block_bytes // (8 * itemsize), 128))
    if HW <= t_hw_cap:
        t_hw, n_hw, mask_tail = HW, 1, False
    else:
        t_hw = t_hw_cap
        n_hw = pl.cdiv(HW, t_hw)
        mask_tail = (HW % t_hw) != 0
    # Sublane (C) tile: multiple of 8 (or full C) targeting ~target_block_bytes per block.
    if t_hw == HW:
        rows = max(8, _round_down(target_block_bytes // max(t_hw * itemsize, 1), 8))
        t_c = C if rows >= C else rows
    else:
        t_c = 8 if C >= 8 else C
    n_c = pl.cdiv(C, t_c)

    pool = functools.partial(_se_pool_kernel, hw=HW, t_hw=t_hw, mask_tail=mask_tail)
    sums = pl.pallas_call(
        pool,
        out_shape=jax.ShapeDtypeStruct((B, C, 1), jnp.float32),
        grid_spec=pltpu.PrefetchScalarGridSpec(
            num_scalar_prefetch=0,
            grid=(B, n_c, n_hw),
            in_specs=[pl.BlockSpec((1, t_c, t_hw), lambda b, c, t: (b, c, t))],
            out_specs=pl.BlockSpec((1, t_c, 1), lambda b, c, t: (b, c, 0)),
        ),
        compiler_params=pltpu.CompilerParams(
            dimension_semantics=("parallel", "parallel", "arbitrary"),
            vmem_limit_bytes=vmem_limit_bytes,
        ),
    )(x2)

    # Tiny excitation in plain XLA (negligible next to the two streaming passes).
    s = _excite(sums[:, :, 0] * (1.0 / HW), w1t, w2t)             # (B, C) f32
    s3 = s[:, :, None]                                            # (B, C, 1)

    return pl.pallas_call(
        _se_scale_kernel,
        out_shape=jax.ShapeDtypeStruct((B, C, HW), x2.dtype),
        grid_spec=pltpu.PrefetchScalarGridSpec(
            num_scalar_prefetch=0,
            grid=(B, n_c, n_hw),
            in_specs=[pl.BlockSpec((1, t_c, t_hw), lambda b, c, t: (b, c, t)),
                      pl.BlockSpec((1, t_c, 1), lambda b, c, t: (b, c, 0))],
            out_specs=pl.BlockSpec((1, t_c, t_hw), lambda b, c, t: (b, c, t)),
        ),
        compiler_params=pltpu.CompilerParams(
            dimension_semantics=("parallel", "parallel", "parallel"),
            vmem_limit_bytes=vmem_limit_bytes,
        ),
        input_output_aliases=({0: 0} if in_place else {}),
    )(x2, s3)


# ---------------------------------------------------------------------------
# Public wrapper.
# ---------------------------------------------------------------------------
@functools.partial(jax.jit, static_argnames=("target_block_bytes", "vmem_budget_bytes",
                                             "force_two_phase", "in_place"))
def se_layer(x, w1, w2, *, target_block_bytes=_TARGET_BLOCK, vmem_budget_bytes=None,
             force_two_phase=False, in_place=False):
    """SELayer forward.  x: (B, C, H, W);  w1 = fc1.weight (C//r, C);  w2 = fc2.weight (C, C//r).
    Set in_place=True to alias x to the output (halves activation HBM footprint)."""
    B, C, H, W = x.shape
    HW = H * W
    c_red = w1.shape[0]
    assert w1.shape == (c_red, C) and w2.shape == (C, c_red)

    if vmem_budget_bytes is None:
        vmem_budget_bytes = _default_vmem_budget()

    itemsize = jnp.dtype(x.dtype).itemsize
    w_bytes = (w1.size * jnp.dtype(w1.dtype).itemsize
               + w2.size * jnp.dtype(w2.dtype).itemsize)
    slab_bytes = C * HW * itemsize                    # one image, one buffer

    # Channels-first throughout: the reshape is free (no HBM relayout pass).  The lane axis
    # is HW; when HW % 128 != 0 the stores are masked, which is far cheaper than the extra
    # HBM read+write pass a transpose to a channels-last layout would cost.
    x2 = x.reshape(B, C, HW)

    # Pre-transpose the tiny weights once so kernels compute y @ W1.T / h @ W2.T directly.
    w1t = jnp.transpose(w1)                           # (C, C_red)
    w2t = jnp.transpose(w2)                           # (C_red, C)

    # Fused path needs 2 in + 2 out double-buffered slabs + weights + compiler scratch.
    fused_fits = 4 * slab_bytes + 2 * w_bytes + (8 << 20) <= vmem_budget_bytes

    if fused_fits and not force_two_phase:
        bt = _pick_batch_tile(B, slab_bytes,
                              min(target_block_bytes, vmem_budget_bytes // 4))
        block = (bt, C, HW)
        vmem_limit = int(min(vmem_budget_bytes,
                             max(4 * bt * slab_bytes + 2 * w_bytes + (8 << 20), 16 << 20)))
        kernel = functools.partial(_se_fused_kernel, inv_hw=1.0 / HW)
        out2 = pl.pallas_call(
            kernel,
            out_shape=jax.ShapeDtypeStruct(x2.shape, x.dtype),
            grid_spec=pltpu.PrefetchScalarGridSpec(
                num_scalar_prefetch=0,
                grid=(B // bt,),
                in_specs=[
                    pl.BlockSpec(block, lambda b: (b, 0, 0)),
                    pl.BlockSpec(w1t.shape, lambda b: (0, 0)),
                    pl.BlockSpec(w2t.shape, lambda b: (0, 0)),
                ],
                out_specs=pl.BlockSpec(block, lambda b: (b, 0, 0)),
            ),
            compiler_params=pltpu.CompilerParams(
                dimension_semantics=("parallel",),
                vmem_limit_bytes=vmem_limit,
            ),
            input_output_aliases=({0: 0} if in_place else {}),
        )(x2, w1t, w2t)
        return out2.reshape(B, C, H, W)

    # Two-phase fallback (slab too large to double-buffer, e.g. big C*HW on v7x's 64 MiB).
    out2 = _se_two_phase_cf(x2, w1t, w2t,
                            target_block_bytes=target_block_bytes,
                            vmem_limit_bytes=int(vmem_budget_bytes),
                            in_place=in_place)
    return out2.reshape(B, C, H, W)


def se_layer_ref(x, w1, w2):
    # Pure-JAX reference mirroring the PyTorch forward.
    y = jnp.mean(x, axis=(2, 3))                    # (B, C)
    y = jnp.maximum(y @ w1.T, 0.0)                  # (B, C//r)
    y = jax.nn.sigmoid(y @ w2.T)                    # (B, C)
    return x * y[:, :, None, None]


if __name__ == "__main__":
    def _check(B, C, H, W, reduction=16, **kwargs):
        key = jax.random.PRNGKey(0)
        kx, k1, k2 = jax.random.split(key, 3)
        c_red = max(1, C // reduction)
        x = jax.random.normal(kx, (B, C, H, W), dtype=jnp.float32)
        w1 = jax.random.normal(k1, (c_red, C), dtype=jnp.float32) * 0.1   # Linear(C, C//r).weight
        w2 = jax.random.normal(k2, (C, c_red), dtype=jnp.float32) * 0.1   # Linear(C//r, C).weight
        out = se_layer(x, w1, w2, **kwargs)
        jax.block_until_ready(out)
        ref = se_layer_ref(x, w1, w2)
        assert out.shape == (B, C, H, W)
        assert jnp.allclose(out, ref, atol=1e-5, rtol=1e-5), \
            f"mismatch vs reference for shape {(B, C, H, W)} {kwargs}"

    # Fused channels-first path, lane-dense (HW = 256), no wrapper transpose.
    _check(2, 32, 16, 16)
    # Fused path with masked lane stores (HW = 49) — still a single HBM pass, no transpose.
    _check(2, 128, 7, 7)
    # Two-phase fallback with the C axis tiled (HW fits one lane tile).
    _check(2, 128, 7, 7, force_two_phase=True, target_block_bytes=4096)
    # Two-phase fallback with a genuinely tiled HW axis and an in-kernel-masked tail tile
    # (HW = 160, t_hw = 128 -> 2 HW tiles, no pad/slice copies).
    _check(2, 32, 16, 10, force_two_phase=True, target_block_bytes=4096)

    print("KERNEL_OK")
</pallas_src>

<mosaic_0001>
module attributes {stable_mosaic.version = 11 : i64} {
  func.func @_se_fused_kernel(%arg0: i32, %arg1: memref<1x32x256xf32, #tpu.memory_space<vmem>>, %arg2: memref<32x2xf32, #tpu.memory_space<vmem>>, %arg3: memref<2x32xf32, #tpu.memory_space<vmem>>, %arg4: memref<1x32x256xf32, #tpu.memory_space<vmem>>) attributes {dimension_semantics = [#tpu.dimension_semantics<parallel>], iteration_bounds = array<i64: 2>, scalar_prefetch = 0 : i64, scratch_operands = 0 : i64, tpu.core_type = #tpu.core_type<tc>, window_params = [{transform_indices = @transform_0, window_bounds = array<i64: 1, 32, 256>}, {pipeline_mode = #tpu.pipeline_mode<synchronous>, transform_indices = @transform_1, window_bounds = array<i64: 32, 2>}, {pipeline_mode = #tpu.pipeline_mode<synchronous>, transform_indices = @transform_2, window_bounds = array<i64: 2, 32>}, {transform_indices = @transform_3, window_bounds = array<i64: 1, 32, 256>}]} {
    %c0 = arith.constant 0 : index
    %c0_0 = arith.constant 0 : index
    %c0_1 = arith.constant 0 : index
    %0 = vector.load %arg1[%c0, %c0_0, %c0_1] : memref<1x32x256xf32, #tpu.memory_space<vmem>>, vector<1x32x256xf32>
    %cst = arith.constant dense<0.000000e+00> : vector<1x32xf32>
    %1 = vector.multi_reduction <add>, %0, %cst [2] : vector<1x32x256xf32> to vector<1x32xf32>
    %cst_2 = arith.constant 3.906250e-03 : f32
    %2 = vector.broadcast %cst_2 : f32 to vector<1x32xf32>
    %3 = arith.mulf %1, %2 : vector<1x32xf32>
    %c0_3 = arith.constant 0 : index
    %c0_4 = arith.constant 0 : index
    %4 = vector.load %arg2[%c0_3, %c0_4] : memref<32x2xf32, #tpu.memory_space<vmem>>, vector<32x2xf32>
    %c0_5 = arith.constant 0 : index
    %c0_6 = arith.constant 0 : index
    %5 = vector.load %arg3[%c0_5, %c0_6] : memref<2x32xf32, #tpu.memory_space<vmem>>, vector<2x32xf32>
    %cst_7 = arith.constant dense<0.000000e+00> : vector<1x2xf32>
    %6 = tpu.matmul %3, %4, %cst_7 {dimension_numbers = #tpu.dot_dimension_numbers<[1], [0], [0], [1], [0, 0, 1, 1], [], []>} : vector<1x32xf32>, vector<32x2xf32>, vector<1x2xf32> -> vector<1x2xf32>
    %cst_8 = arith.constant 0.000000e+00 : f32
    %7 = vector.broadcast %cst_8 : f32 to vector<1x2xf32>
    %8 = arith.maximumf %6, %7 : vector<1x2xf32>
    %cst_9 = arith.constant dense<0.000000e+00> : vector<1x32xf32>
    %9 = tpu.matmul %8, %5, %cst_9 {dimension_numbers = #tpu.dot_dimension_numbers<[1], [0], [0], [1], [0, 0, 1, 1], [], []>} : vector<1x2xf32>, vector<2x32xf32>, vector<1x32xf32> -> vector<1x32xf32>
    %10 = arith.negf %9 : vector<1x32xf32>
    %11 = math.exp %10 : vector<1x32xf32>
    %cst_10 = arith.constant 1.000000e+00 : f32
    %12 = vector.broadcast %cst_10 : f32 to vector<1x32xf32>
    %13 = arith.addf %12, %11 : vector<1x32xf32>
    %14 = arith.divf %12, %13 : vector<1x32xf32>
    %15 = vector.shape_cast %14 : vector<1x32xf32> to vector<1x32x1xf32>
    %16 = vector.broadcast %15 : vector<1x32x1xf32> to vector<1x32x256xf32>
    %17 = arith.mulf %0, %16 : vector<1x32x256xf32>
    %c0_11 = arith.constant 0 : index
    %c0_12 = arith.constant 0 : index
    %c0_13 = arith.constant 0 : index
    %18 = vector.load %arg4[%c0_11, %c0_12, %c0_13] : memref<1x32x256xf32, #tpu.memory_space<vmem>>, vector<1x32x256xf32>
    tpu.vector_store %arg4[%c0_11, %c0_12, %c0_13], %17 {strides = array<i32>} : memref<1x32x256xf32, #tpu.memory_space<vmem>>, vector<1x32x256xf32>,
    return
  }
  func.func @transform_0(%arg0: i32) -> (i32, i32, i32) {
    %c0_i32 = arith.constant 0 : i32
    %c0_i32_0 = arith.constant 0 : i32
    %c0_i32_1 = arith.constant 0 : i32
    return %arg0, %c0_i32, %c0_i32_0 : i32, i32, i32
  }
  func.func @transform_1(%arg0: i32) -> (i32, i32) {
    %c0_i32 = arith.constant 0 : i32
    %c0_i32_0 = arith.constant 0 : i32
    %c0_i32_1 = arith.constant 0 : i32
    return %c0_i32, %c0_i32_0 : i32, i32
  }
  func.func @transform_2(%arg0: i32) -> (i32, i32) {
    %c0_i32 = arith.constant 0 : i32
    %c0_i32_0 = arith.constant 0 : i32
    %c0_i32_1 = arith.constant 0 : i32
    return %c0_i32, %c0_i32_0 : i32, i32
  }
  func.func @transform_3(%arg0: i32) -> (i32, i32, i32) {
    %c0_i32 = arith.constant 0 : i32
    %c0_i32_0 = arith.constant 0 : i32
    %c0_i32_1 = arith.constant 0 : i32
    return %arg0, %c0_i32, %c0_i32_0 : i32, i32, i32
  }
}

</mosaic_0001>

<bundles_post_ra>
// kernel: se_layer.1
= control target key start
LH: loop header
LB: loop body
LE: loop exit
PB: predicated region body
PF: predicated region fallthrough
CT: control target
= control target key end

     0   :  { %s571_s12 = smov 0   ;;  %s642_s0 = inlined_call_operand.vmem [shape: f32[2,32,256], index: 0, kind: input, shape index: {}]   ;;  %s643_s1 = inlined_call_operand.vmem [shape: f32[32,2], index: 1, kind: input, shape index: {}]   ;;  %s644_s2 = inlined_call_operand.vmem [shape: f32[2,32], index: 2, kind: input, shape index: {}]   ;;  %s645_s3 = inlined_call_operand.vmem [shape: f32[2,32,256], index: 3, kind: output, shape index: {}]  }
   0x1 LB: > { %s479_s13 = sadd.s32 4294967295, %s546_s12   ;;  %p483_p0 = scmp.ge.s32.totalorder %s546_s12, 1  ;;  %s546_s12 = sphi %s571_s12, %s13_s12  }
   0x2   : > { %p137_p1 = scmp.lt.s32.totalorder %s546_s12, 3 }
   0x4   : > { %p138_p2 = pnand %p483_p0, %p137_p1 }
   0x5   : > { %p161_p3 = scmp.lt.s32.totalorder (!%p138_p2), %s479_s13, 1  ;;  %v195_v12 = vld [vmem:[%s643_s1] sm:$0xff] (!%p138_p2)  ;;  %v196_v13 = vld [vmem:[%s643_s1 + $0x8] sm:$0xff] (!%p138_p2)  ;;  %v548_v15 = vmov (!%p138_p2), 0.0|0.0   ;;  %v197_v16 = vld [vmem:[%s643_s1 + $0x10] sm:$0xff] (!%p138_p2)  ;;  %vm549_vm0 = vmmov (!%p138_p2), 0   ;;  %v204_v20 = vlaneseq (!%p138_p2) }
   0x6   : > { %141 = sbr.rel (%p138_p2) target bundleno = 752 (0x2f0), region = 32  ;;  %v520_v14 = vpack.c.bf16 (!%p138_p2), %v196_v13, %v195_v12  ;;  %519 = vmatprep.subr.bf16.mxu0 (!%p138_p2), %v548_v15  ;;  %v198_v17 = vld [vmem:[%s643_s1 + $0x18] sm:$0xff] (!%p138_p2)  ;;  %v550_v19 = vmov (!%p138_p2), 0.0   ;;  %vm215_vm1 = vcmask (!%p138_p2), 130112   ;;  %vm222_vm2 = vcmask (!%p138_p2), 195712  }
   0x7   : > { %v523_v18 = vpack.c.bf16 (!%p138_p2), %v198_v17, %v197_v16  ;;  %511 = vmatprep.mubr.msk.f32.mxu0 (!%p138_p2), %vm549_vm0, %v550_v19  ;;  %514 = vmatprep.subr.mxu1 (!%p138_p2), %v550_v19  ;;  %v205_v21 = vand.u32 (!%p138_p2), 127, %v204_v20  ;;  %v207_v22 = vshrl.u32 (!%p138_p2), %v204_v20, 7  ;;  %vm229_vm3 = vcmask (!%p138_p2), 261312   ;;  %v199_v45 = vld [vmem:[%s644_s2] sm:$0x3] (!%p138_p2) }
   0x8   : > { %521 = vmatpush3.bf16.msra.mxu0 (!%p138_p2), %v520_v14  ;;  %516 = vmatprep.mubr.msk.f32.mxu1 (!%p138_p2), %vm549_vm0, %v550_v19  ;;  %vm231_vm4 = vcmask (!%p138_p2), 261120   ;;  %vm309_vm5 = vcmask (!%p138_p2), 1041408   ;;  %vm305_vm6 = vcmask (!%p138_p2), 15360  }
   0x9   : > { %522 = vmatprep.subr.bf16.mxu0 (!%p138_p2), %v548_v15  ;;  %v210_v23 = vadd.s32 (!%p138_p2), 4294967288, %v205_v21  ;;  %v217_v25 = vadd.s32 (!%p138_p2), 4294967280, %v205_v21  ;;  %v224_v26 = vadd.s32 (!%p138_p2), 4294967272, %v205_v21  ;;  %v208_v28 = vsub.s32 (!%p138_p2), %v205_v21, %v207_v22  ;;  %515 = vmatpush3.msk.msra.mxu1 (!%p138_p2), %vm309_vm5, %v199_v45 }
   0xa   : > { %v391_v54 = vsub.s32 (!%p138_p2), 0, %v207_v22 }
   0xb   : > { %v213_v30 = vsub.s32 (!%p138_p2), %v210_v23, %v207_v22  ;;  %v220_v31 = vsub.s32 (!%p138_p2), %v217_v25, %v207_v22  ;;  %v227_v34 = vsub.s32 (!%p138_p2), %v224_v26, %v207_v22 }
   0xc   : > { %524 = vmatpush3.bf16.msra.mxu0 (!%p138_p2), %v523_v18 }
   0xd   : > { %s647_s13 = smov (!%p161_p3, %s479_s13), 1 }
   0xe   : > { %s494_s14 = sshll.u32 %s647_s13, 6 }
   0xf   : > { %s165_s17 = scalar_lea.vmem %s642_s0, %s494_s14  ;;  %s170_s30 = scalar_lea.vmem %s645_s3, %s494_s14 }
  0x10   : > { %v587_v0 = vld [vmem:[%s165_s17] sm:$0xff]  ;;  %v589_v1 = vld [vmem:[%s165_s17 + $0x8] sm:$0xff]  ;;  %v597_v5 = vld [vmem:[%s165_s17 + $0x10] sm:$0xff] }
  0x11   : > { %v591_v2 = vld [vmem:[%s165_s17 + $0x20] sm:$0xff]  ;;  %v179_v3 = vadd.f32 %v589_v1, %v587_v0  ;;  %v595_v4 = vld [vmem:[%s165_s17 + $0x28] sm:$0xff]  ;;  %v599_v6 = vld [vmem:[%s165_s17 + $0x18] sm:$0xff] }
  0x12   : > { %v185_v7 = vadd.f32 %v595_v4, %v591_v2  ;;  %v603_v8 = vld [vmem:[%s165_s17 + $0x30] sm:$0xff]  ;;  %v605_v9 = vld [vmem:[%s165_s17 + $0x38] sm:$0xff]  ;;  %v182_v10 = vadd.f32 %v599_v6, %v597_v5 }
  0x13   : > { %180 = vadd.xlane.f32.xlu0 %v179_v3  ;;  %v188_v11 = vadd.f32 %v605_v9, %v603_v8 }
  0x14   : > { %186 = vadd.xlane.f32.xlu1 %v185_v7 }
  0x17   : > { %183 = vadd.xlane.f32.xlu0 %v182_v10 }
  0x18   : > { %189 = vadd.xlane.f32.xlu1 %v188_v11 }
  0xa0   : > { %v181_v24 = vpop.xlane.xlu0 %180 }
  0xa1   : > { %v187_v27 = vpop.xlane.xlu1 %186  ;;  %v191_v29 = vmul.f32 0.00390625, %v181_v24 }
  0xa2   : > { %v193_v32 = vmul.f32 0.00390625, %v187_v27 }
  0xa3   : > { %v209_v38 = vrot.slane %v191_v29, %v208_v28 }
  0xa4   : > { %v184_v33 = vpop.xlane.xlu0 %183  ;;  %v221_v40 = vrot.slane %v193_v32, %v220_v31 }
  0xa5   : > { %v192_v35 = vmul.f32 0.00390625, %v184_v33  ;;  %v190_v36 = vpop.xlane.xlu1 %189 }
  0xa6   : > { %v194_v37 = vmul.f32 0.00390625, %v190_v36 }
  0xa7   : > { %v214_v39 = vrot.slane %v192_v35, %v213_v30 }
  0xa8   : > { %v228_v41 = vrot.slane %v194_v37, %v227_v34 }
  0xa9   : > { %v216_v42 = vsel %vm215_vm1, %v214_v39, %v209_v38 }
  0xaa   : > { %v223_v43 = vsel %vm222_vm2, %v221_v40, %v216_v42 }
  0xab   : > { %v230_v44 = vsel %vm229_vm3, %v228_v41, %v223_v43 }
  0xac   : > { %512 = vmatmul.mubr.msk.f32.vlgmr.msra.gmra.mrb[0].mxu0 %vm231_vm4, %v230_v44 }
 0x17f   : > { %v300_v46 = vpop.f32.mrb[0].mxu0 }
 0x180   : > { %v304_v47 = vmax.f32 %v300_v46, 0.0  ;;  %v513_v48 = vpop.f32.mrb[1].mxu0 }
 0x182   : > { %517 = vmatmul.mubr.msk.f32.vlgmr.msra.gmra.mrb[0].mxu1 %vm305_vm6, %v304_v47 }
 0x255   : > { %v379_v49 = vpop.f32.mrb[0].mxu1 }
 0x256   : > { %v491_v50 = vmul.f32 -1.442695, %v379_v49  ;;  %v518_v51 = vpop.f32.mrb[1].mxu1 }
 0x258   : > { %536 = vpow2.f32 %v491_v50 }
 0x262   : > { %v537_v52 = vpop.eup %536 }
 0x263   : > { %v386_v53 = vadd.f32 1.0, %v537_v52 }
 0x265   : > { %538 = vrcp.f32 %v386_v53 }
 0x26f   : > { %v539_v55 = vpop.eup %538 }
 0x270   : > { %v392_v56 = vrot.slane %v539_v55, %v391_v54 }
 0x272   : > { %398 = vbcast.lane.b32.xlu1 %v392_v56, 264  ;;  %394 = vbcast.lane.b32.xlu0 %v392_v56, 256 }
 0x276   : > { %402 = vbcast.lane.b32.xlu1 %v392_v56, 272 }
 0x27a   : > { %406 = vbcast.lane.b32.xlu1 %v392_v56, 280 }
 0x2e4   : > { %v399_v57 = vpop.permute.xlu1 %398  ;;  %v395_v58 = vpop.permute.xlu0 %394 }
 0x2e5   : > { %v410_v59 = vmul.f32 %v399_v57, %v597_v5  ;;  %v411_v60 = vmul.f32 %v399_v57, %v599_v6  ;;  %v408_v61 = vmul.f32 %v395_v58, %v587_v0  ;;  %v409_v62 = vmul.f32 %v395_v58, %v589_v1 }
 0x2e7   : > { %418 = vst [vmem:[%s170_s30 + $0x10] sm:$0xff] %v410_v59  ;;  %419 = vst [vmem:[%s170_s30 + $0x18] sm:$0xff] %v411_v60 }
 0x2e8   : > { %416 = vst [vmem:[%s170_s30] sm:$0xff] %v408_v61  ;;  %417 = vst [vmem:[%s170_s30 + $0x8] sm:$0xff] %v409_v62  ;;  %v403_v63 = vpop.permute.xlu1 %402 }
 0x2e9   : > { %v412_v3 = vmul.f32 %v403_v63, %v591_v2  ;;  %v413_v7 = vmul.f32 %v403_v63, %v595_v4 }
 0x2eb   : > { %420 = vst [vmem:[%s170_s30 + $0x20] sm:$0xff] %v412_v3  ;;  %421 = vst [vmem:[%s170_s30 + $0x28] sm:$0xff] %v413_v7 }
 0x2ec   : > { %v407_v10 = vpop.permute.xlu1 %406 }
 0x2ed   : > { %v414_v5 = vmul.f32 %v407_v10, %v603_v8  ;;  %v415_v6 = vmul.f32 %v407_v10, %v605_v9 }
 0x2ef   : > { %422 = vst [vmem:[%s170_s30 + $0x30] sm:$0xff] %v414_v5  ;;  %423 = vst [vmem:[%s170_s30 + $0x38] sm:$0xff] %v415_v6 }
 0x2f0 PF: > { %s13_s12 = sadd.s32 1, %s546_s12  }
 0x2f1   : > { %p10_p4 = scmp.ge.s32.totalorder %s13_s12, 4  }
 0x2f3   :  { %12 = sbr.rel (!%p10_p4) target bundleno = 1 (0x1), region = 62 }

</bundles_post_ra>
